<compile_context>
chip_gen: v7x
topology: tpu7x:2x2x1
jax: 0.10.0
libtpu: 0.0.40
codegen_flags: <defaults>
</compile_context>

<pallas_src>
import math
from functools import partial

import jax
import jax.numpy as jnp
from jax import lax
from jax.experimental import pallas as pl
from jax.experimental.pallas import tpu as pltpu


def _round_up(x: int, m: int) -> int:
    return -(-x // m) * m


_CHUNK = 256  # inner compute chunk: keeps hot/(chunk, Vp) intermediates in vregs


def stamp_embedding_kernel(packed_ref, tab_ref, o_ref, *, chunk: int):
    """One grid step = one (nt, D) output slab, processed in `chunk`-row pieces.

    packed_ref : (nt, 1) int32 bit-packed, pre-offset fused-table indices
                   bits [0:8)   month index          (0..12)
                   bits [8:16)  weekday index + 13   (13..18)
                   bits [16:24) day index + 19       (19..50)
    tab_ref    : (Vp, D) f32 fused [month; week; day] table (zero-padded rows)
    o_ref      : (nt, D) output slab
    """
    nt = o_ref.shape[0]
    vp = tab_ref.shape[0]
    num_chunks = nt // chunk

    tab = tab_ref[...]                                       # tiny, resident
    # Hoisted: JAX does not CSE broadcast_in_dim inside loops.
    cols = lax.broadcasted_iota(jnp.int32, (chunk, vp), 1)

    def body(c, carry):
        off = pl.multiple_of(c * chunk, chunk)
        p = packed_ref[pl.ds(off, chunk), :]                 # (chunk, 1) int32
        im = p & 0xFF
        iw = (p >> 8) & 0xFF
        idd = (p >> 16) & 0xFF
        # Multi-hot selection over three disjoint ranges of the fused table:
        # one MXU matmul == month_row + week_row + day_row for every position.
        hot = ((cols == im) | (cols == iw) | (cols == idd)).astype(jnp.float32)
        o_ref[pl.ds(off, chunk), :] = jnp.dot(
            hot, tab, preferred_element_type=jnp.float32).astype(o_ref.dtype)
        return carry

    lax.fori_loop(0, num_chunks, body, 0, unroll=True)


def stamp_embedding(month, weekday, day, month_tab, week_tab, day_tab,
                    *, row_tile=4096):
    idx_shape = month.shape
    assert weekday.shape == idx_shape and day.shape == idx_shape

    D = month_tab.shape[1]
    Vm, Vw, Vd = month_tab.shape[0], week_tab.shape[0], day_tab.shape[0]
    V = Vm + Vw + Vd
    Vp = _round_up(V, 8)

    # Fuse the three tiny tables -> single matmul operand (sublane-padded).
    table = jnp.concatenate([month_tab, week_tab, day_tab], axis=0)   # (V, D)
    if Vp != V:
        table = jnp.pad(table, ((0, Vp - V), (0, 0)))

    # Bit-pack the three pre-offset index streams into ONE int32 stream:
    # one DMA descriptor / one lane-padded VMEM buffer per tile instead of three.
    n = int(math.prod(idx_shape))
    m = month.reshape(-1).astype(jnp.int32)                 # 0..12
    w = weekday.reshape(-1).astype(jnp.int32) + Vm          # 13..18
    d = day.reshape(-1).astype(jnp.int32) + (Vm + Vw)       # 19..50
    packed = m | (w << 8) | (d << 16)

    # Tile selection: biggest DMA tile that amortizes per-step overhead while the
    # double-buffered output + packed-index VMEM footprint stays modest (v5e's
    # scoped-VMEM default is only 16 MiB; v7x physical VMEM is 64 MiB).
    if n <= _CHUNK:
        chunk = _round_up(n, 8)
        nt = chunk
    else:
        chunk = _CHUNK
        lane_d = max(_round_up(D, 128), 128)
        bytes_per_row = 4 * (lane_d + 128)                  # out slab + packed idx (lane-padded)
        max_rows = max(chunk, ((12 << 20) // (2 * bytes_per_row)) // chunk * chunk)
        rt = max(chunk, (row_tile // chunk) * chunk)
        nt = min(_round_up(n, chunk), rt, max_rows)

    npad = _round_up(n, nt)
    pad = npad - n
    if pad:
        # Padded tail rows (packed == 0) select month_tab[0]; sliced off below.
        packed = jnp.pad(packed, (0, pad))
    packed = packed.reshape(npad, 1)

    out = pl.pallas_call(
        partial(stamp_embedding_kernel, chunk=chunk),
        out_shape=jax.ShapeDtypeStruct((npad, D), month_tab.dtype),
        grid_spec=pltpu.PrefetchScalarGridSpec(
            num_scalar_prefetch=0,
            grid=(npad // nt,),
            in_specs=[
                pl.BlockSpec((nt, 1), lambda i: (i, 0)),    # packed indices
                pl.BlockSpec((Vp, D), lambda i: (0, 0)),    # fused table (resident)
            ],
            out_specs=pl.BlockSpec((nt, D), lambda i: (i, 0)),
        ),
        compiler_params=pltpu.CompilerParams(
            dimension_semantics=("parallel",)),
    )(packed, table)

    if pad:
        # TODO(synk): for hot paths, pick shapes so pad == 0 (or mask the tail)
        # to avoid this extra read+write of the result.
        out = out[:n]
    return out.reshape(*idx_shape, D)


def stamp_embedding_ref(month, weekday, day, month_tab, week_tab, day_tab):
    month_x = jnp.take(month_tab, month, axis=0)
    week_x = jnp.take(week_tab, weekday, axis=0)
    day_x = jnp.take(day_tab, day, axis=0)
    return day_x + week_x + month_x


if __name__ == "__main__":
    B, S, out_dim = 2, 8, 32

    key = jax.random.PRNGKey(0)
    k1, k2, k3, k4, k5, k6 = jax.random.split(key, 6)

    month = jax.random.randint(k1, (B, S), 0, 13, dtype=jnp.int32)
    weekday = jax.random.randint(k2, (B, S), 0, 6, dtype=jnp.int32)
    day = jax.random.randint(k3, (B, S), 0, 32, dtype=jnp.int32)

    month_tab = jax.random.normal(k4, (13, out_dim), dtype=jnp.float32)
    week_tab = jax.random.normal(k5, (6, out_dim), dtype=jnp.float32)
    day_tab = jax.random.normal(k6, (32, out_dim), dtype=jnp.float32)

    out = stamp_embedding(month, weekday, day, month_tab, week_tab, day_tab)
    out = jax.block_until_ready(out)

    ref = stamp_embedding_ref(month, weekday, day, month_tab, week_tab, day_tab)
    assert out.shape == (B, S, out_dim)
    assert jnp.allclose(out, ref, atol=1e-5, rtol=1e-5), "mismatch vs reference"

    print("KERNEL_OK")
</pallas_src>

<mosaic_0001>
module attributes {stable_mosaic.version = 11 : i64} {
  func.func @stamp_embedding_kernel(%arg0: i32, %arg1: memref<16x1xi32, #tpu.memory_space<vmem>>, %arg2: memref<56x32xf32, #tpu.memory_space<vmem>>, %arg3: memref<16x32xf32, #tpu.memory_space<vmem>>) attributes {dimension_semantics = [#tpu.dimension_semantics<parallel>], iteration_bounds = array<i64: 1>, scalar_prefetch = 0 : i64, scratch_operands = 0 : i64, tpu.core_type = #tpu.core_type<tc>, window_params = [{transform_indices = @transform_0, window_bounds = array<i64: 16, 1>}, {pipeline_mode = #tpu.pipeline_mode<synchronous>, transform_indices = @transform_1, window_bounds = array<i64: 56, 32>}, {transform_indices = @transform_2, window_bounds = array<i64: 16, 32>}]} {
    %c0 = arith.constant 0 : index
    %c0_0 = arith.constant 0 : index
    %0 = vector.load %arg2[%c0, %c0_0] : memref<56x32xf32, #tpu.memory_space<vmem>>, vector<56x32xf32>
    %1 = tpu.iota {dimensions = array<i32: 1>} : vector<16x56xi32>
    %c0_i32 = arith.constant 0 : i32
    %c16_i32 = arith.constant 16 : i32
    %2 = arith.muli %c0_i32, %c16_i32 : i32
    %3 = tpu.assume_multiple %2, 16 : i32
    %4 = arith.index_cast %3 : i32 to index
    %c0_1 = arith.constant 0 : index
    %5 = vector.load %arg1[%4, %c0_1] : memref<16x1xi32, #tpu.memory_space<vmem>>, vector<16x1xi32>
    %c255_i32 = arith.constant 255 : i32
    %6 = vector.broadcast %c255_i32 : i32 to vector<16x1xi32>
    %7 = arith.andi %5, %6 : vector<16x1xi32>
    %c8_i32 = arith.constant 8 : i32
    %8 = vector.broadcast %c8_i32 : i32 to vector<16x1xi32>
    %9 = arith.shrsi %5, %8 : vector<16x1xi32>
    %c255_i32_2 = arith.constant 255 : i32
    %10 = vector.broadcast %c255_i32_2 : i32 to vector<16x1xi32>
    %11 = arith.andi %9, %10 : vector<16x1xi32>
    %c16_i32_3 = arith.constant 16 : i32
    %12 = vector.broadcast %c16_i32_3 : i32 to vector<16x1xi32>
    %13 = arith.shrsi %5, %12 : vector<16x1xi32>
    %c255_i32_4 = arith.constant 255 : i32
    %14 = vector.broadcast %c255_i32_4 : i32 to vector<16x1xi32>
    %15 = arith.andi %13, %14 : vector<16x1xi32>
    %16 = vector.broadcast %7 : vector<16x1xi32> to vector<16x56xi32>
    %17 = arith.cmpi eq, %1, %16 : vector<16x56xi32>
    %18 = vector.broadcast %11 : vector<16x1xi32> to vector<16x56xi32>
    %19 = arith.cmpi eq, %1, %18 : vector<16x56xi32>
    %20 = arith.ori %17, %19 : vector<16x56xi1>
    %21 = vector.broadcast %15 : vector<16x1xi32> to vector<16x56xi32>
    %22 = arith.cmpi eq, %1, %21 : vector<16x56xi32>
    %23 = arith.ori %20, %22 : vector<16x56xi1>
    %24 = arith.extui %23 : vector<16x56xi1> to vector<16x56xi32>
    %25 = arith.sitofp %24 : vector<16x56xi32> to vector<16x56xf32>
    %cst = arith.constant dense<0.000000e+00> : vector<16x32xf32>
    %26 = tpu.matmul %25, %0, %cst {dimension_numbers = #tpu.dot_dimension_numbers<[1], [0], [0], [1], [0, 0, 1, 1], [], []>} : vector<16x56xf32>, vector<56x32xf32>, vector<16x32xf32> -> vector<16x32xf32>
    %27 = arith.index_cast %3 : i32 to index
    %c0_5 = arith.constant 0 : index
    %28 = vector.load %arg3[%27, %c0_5] : memref<16x32xf32, #tpu.memory_space<vmem>>, vector<16x32xf32>
    tpu.vector_store %arg3[%27, %c0_5], %26 {strides = array<i32>} : memref<16x32xf32, #tpu.memory_space<vmem>>, vector<16x32xf32>,
    %c1_i32 = arith.constant 1 : i32
    return
  }
  func.func @transform_0(%arg0: i32) -> (i32, i32) {
    %c0_i32 = arith.constant 0 : i32
    %c0_i32_0 = arith.constant 0 : i32
    return %arg0, %c0_i32 : i32, i32
  }
  func.func @transform_1(%arg0: i32) -> (i32, i32) {
    %c0_i32 = arith.constant 0 : i32
    %c0_i32_0 = arith.constant 0 : i32
    %c0_i32_1 = arith.constant 0 : i32
    return %c0_i32, %c0_i32_0 : i32, i32
  }
  func.func @transform_2(%arg0: i32) -> (i32, i32) {
    %c0_i32 = arith.constant 0 : i32
    %c0_i32_0 = arith.constant 0 : i32
    return %arg0, %c0_i32 : i32, i32
  }
}

</mosaic_0001>

<bundles_post_ra>
// kernel: tpu_custom_call.1
= control target key start
LH: loop header
LB: loop body
LE: loop exit
PB: predicated region body
PF: predicated region fallthrough
CT: control target
= control target key end

     0   :  { %v239_v3 = vmov 0   ;;  %s298_s0 = inlined_call_operand.vmem [shape: s32[16,1], index: 0, kind: input, shape index: {}]   ;;  %s299_s1 = inlined_call_operand.vmem [shape: f32[56,32], index: 1, kind: input, shape index: {}]   ;;  %s300_s2 = inlined_call_operand.hbm [shape: f32[16,32], index: 2, kind: output, shape index: {}]  }
   0x1   :  { %v22_v0 = vld [vmem:[%s298_s0 + $0x8] sm:$0xff]  ;;  %v21_v1 = vld [vmem:[%s298_s0] sm:$0xff]  ;;  %214 = vset.pattern.permute.xlu1 %v239_v3  ;;  %213 = vset.pattern.permute.xlu0 %v239_v3  ;;  %v14_v11 = vld [vmem:[%s299_s1 + $0x10] sm:$0xff] }
   0x2   :  { %v12_v2 = vld [vmem:[%s299_s1] sm:$0xff]  ;;  %v24_v4 = vand.u32 255, %v22_v0  ;;  %v23_v5 = vand.u32 255, %v21_v1  ;;  %v26_v6 = vshra.s32 %v22_v0, 8  ;;  %v25_v7 = vshra.s32 %v21_v1, 8  ;;  %v13_v8 = vld [vmem:[%s299_s1 + $0x8] sm:$0xff] }
   0x3   :  { %v30_v9 = vshra.s32 %v22_v0, 16  ;;  %v196_v10 = vpack.c.bf16 %v13_v8, %v12_v2  ;;  %v15_v12 = vld [vmem:[%s299_s1 + $0x18] sm:$0xff]  ;;  %v29_v15 = vshra.s32 %v21_v1, 16 }
   0x4   :  { %37 = vperm.xlu1 %214, %v24_v4   ;;  %34 = vperm.xlu0 %213, %v23_v5   ;;  %v28_v13 = vand.u32 255, %v26_v6  ;;  %v27_v14 = vand.u32 255, %v25_v7  ;;  %v200_v16 = vpack.c.bf16 %v15_v12, %v14_v11 }
   0x5   :  { %7 = vsyncpa [#allocation3], 0  ;;  %197 = vmatprep.subr.bf16.mxu0 %v196_v10  ;;  %v32_v17 = vand.u32 255, %v30_v9  ;;  %v31_v18 = vand.u32 255, %v29_v15  ;;  %v16_v19 = vld [vmem:[%s299_s1 + $0x20] sm:$0xff]  ;;  %v17_v20 = vld [vmem:[%s299_s1 + $0x28] sm:$0xff]  ;;  %v19_v23 = vlaneseq }
   0x6   :  { %199 = vmatpush3.bf16.msra.mxu0 %v196_v10  ;;  %v204_v21 = vpack.c.bf16 %v17_v20, %v16_v19  ;;  %v18_v22 = vld [vmem:[%s299_s1 + $0x30] sm:$0xff]  ;;  %vm65_vm9 = vcmask 457728   ;;  %v240_v31 = vmov 0.0   ;;  %s241_s1 = smov [#allocation2]   ;;  %vm147_vm11 = vcmask 261120  }
   0x7   :  { %201 = vmatprep.subr.bf16.mxu0 %v200_v16  ;;  %v20_v26 = vand.u32 127, %v19_v23  ;;  %s155_s26 = sshll.u32 %s241_s1, 4  ;;  %s156_s26 = int_to_ptr.vmem [resolvable:$true] %s155_s26 }
   0x8   :  { %45 = vperm.xlu1 %214, %v28_v13   ;;  %42 = vperm.xlu0 %213, %v27_v14   ;;  %s215_s27 = scalar_lea.vmem %s156_s26, 256  ;;  %p220_p1 = scmp.lt.s32.totalorder %s156_s26, %s156_s26 }
   0x9   :  { %p216_p0 = scmp.ne.s32.totalorder %s156_s26, %s215_s27  ;;  %p221_p2 = scmp.lt.s32.totalorder %s215_s27, %s215_s27 }
   0xa   :  { %203 = vmatpush3.bf16.msra.mxu0 %v200_v16 }
   0xb   :  { %205 = vmatprep.subr.bf16.mxu0 %v204_v21  ;;  %p222_p3 = por %p221_p2, %p220_p1 }
   0xc   :  { %55 = vperm.xlu1 %214, %v32_v17   ;;  %52 = vperm.xlu0 %213, %v31_v18  }
   0xd   :  { %p223_p4 = pnand %p222_p3, %p216_p0 }
   0xe   :  { %207 = vmatpush3.bf16.msra.mxu0 %v204_v21 }
   0xf   :  { %191 = vmatprep.subr.mxu0 %v18_v22 }
  0x12   :  { %192 = vmatpush3.msra.mxu0 %v18_v22 }
  0x83   :  { %v38_v24 = vpop.permute.xlu1 %37  ;;  %v35_v25 = vpop.permute.xlu0 %34 }
  0x84   :  { %vm40_vm2 = vcmp.eq.s32.totalorder %v20_v26, %v38_v24  ;;  %vm39_vm3 = vcmp.eq.s32.totalorder %v20_v26, %v35_v25 }
  0x87   :  { %v46_v27 = vpop.permute.xlu1 %45  ;;  %v43_v28 = vpop.permute.xlu0 %42 }
  0x88   :  { %vm48_vm0 = vcmp.eq.s32.totalorder %v20_v26, %v46_v27  ;;  %vm47_vm1 = vcmp.eq.s32.totalorder %v20_v26, %v43_v28 }
  0x89   :  { %vm50_vm4 = vmor %vm40_vm2, %vm48_vm0 }
  0x8a   :  { %vm49_vm5 = vmor %vm39_vm3, %vm47_vm1 }
  0x8b   :  { %v56_v29 = vpop.permute.xlu1 %55  ;;  %v53_v30 = vpop.permute.xlu0 %52 }
  0x8c   :  { %vm58_vm6 = vcmp.eq.s32.totalorder %v20_v26, %v56_v29  ;;  %vm57_vm7 = vcmp.eq.s32.totalorder %v20_v26, %v53_v30 }
  0x8d   :  { %vm60_vm8 = vmor %vm50_vm4, %vm58_vm6 }
  0x8e   :  { %vm59_vm10 = vmor %vm49_vm5, %vm57_vm7  ;;  %v167_v32 = vsel %vm60_vm8, 1.0, %v240_v31 }
  0x8f   :  { %v166_v33 = vsel %vm59_vm10, 1.0, %v240_v31 }
  0x90   :  { %193 = vmatprep.mubr.msk.f32.mxu0 %vm65_vm9, %v166_v33 }
  0x91   :  { %194 = vmatmul.mubr.msk.f32.vlgmr.msra.gmra.mrb[0].mxu0 %vm65_vm9, %v167_v32 }
 0x164   :  { %v195_v34 = vpop.f32.mrb[0].mxu0 }
 0x165   :  { %149 = vst.msk [vmem:[#allocation2 + $0x8] sm:$0xff] %vm147_vm11, %v195_v34  ;;  %v138_v35 = vpop.f32.mrb[1].mxu0 }
 0x166   :  { %148 = vst.msk [vmem:[#allocation2] sm:$0xff] %vm147_vm11, %v138_v35 }
 0x167   :  { %226 = shalt.err (!%p223_p4)
}
 0x168   :  { %s227_s30 = scalar_lea.hbm %s300_s2, 256 }
 0x169   :  { %p228_p5 = scmp.ne.s32.totalorder %s300_s2, %s227_s30  ;;  %p231_p6 = scmp.lt.u32.totalorder %s227_s30, %s300_s2 }
 0x16b   :  { %p233_p7 = pnand %p231_p6, %p228_p5 }
 0x16d   :  { %236 = shalt.err (!%p233_p7)
}
 0x16e   :  { %s242_s7 = smov 128   ;;  %s243_s8 = smov 8  }
 0x16f   :  { %161 = dma.vmem_to_hbm [thread:$0]  %s156_s26, 256, %s300_s2, [#allocation3], %s242_s7, %s242_s7, %s243_s8  }
 0x170   :  { %237 = dma.done.wait [#allocation3], 256  }
 0x171   :  { %238 = vsyncadd [#allocation3], 4294967040 }
 0x172   :  { %165 = vsyncpa [#allocation3], 1 }

</bundles_post_ra>
